<compile_context>
chip_gen: v6e
topology: v6e:2x2x1
jax: 0.10.0
libtpu: 0.0.40
codegen_flags: <defaults>
</compile_context>

<pallas_src>
import functools

import jax
import jax.numpy as jnp
from jax.experimental import pallas as pl
from jax.experimental.pallas import tpu as pltpu


def _round_up(a, b):
    return (a + b - 1) // b * b


@functools.lru_cache(maxsize=None)
def _tpu_vmem_info():
    """Returns (vmem_capacity_bytes, has_two_tensorcores) with a safe fallback."""
    try:
        cap = int(pltpu.get_tpu_info().vmem_capacity_bytes)
    except Exception:
        cap = 64 * 1024 * 1024          # assume tightest target (v7x) if unknown
    # v7x: 64 MiB VMEM per TensorCore, 2 TCs/chip.  v5e/v6e: 128 MiB, 1 TC.
    return cap, cap <= 64 * 1024 * 1024


def _outconv_kernel(x_ref, w_ref, b_ref, o_ref):
    # x_ref: (BB, K, TM)    activation columns for this (batch-block, M) tile
    # w_ref: (TCO, K)       weight tile (grid-constant along batch / M axes)
    # b_ref: (TCO, 1)       bias column (broadcast over lanes)
    # o_ref: (BB, TCO, TM)  lane-dense output tile
    w = w_ref[...]
    b = b_ref[...]
    for bi in range(x_ref.shape[0]):     # static, small unrolled batch block
        acc = jnp.dot(w, x_ref[bi], preferred_element_type=jnp.float32)
        o_ref[bi] = (acc + b).astype(o_ref.dtype)


@functools.partial(jax.jit, static_argnames=("kernel_size", "tm", "step_bytes"))
def out_conv_block(x_nchw, weight, bias, *, kernel_size=1, tm=32768,
                   step_bytes=4 * 1024 * 1024):
    """Forward of OutConvBlock (Conv2d with padding='same').

    x_nchw : (N, Cin, H, W)
    weight : (Cout, Cin, k, k)   (PyTorch Conv2d layout)
    bias   : (Cout,)
    returns: (N, Cout, H, W)
    """
    n, cin, h, w = x_nchw.shape
    cout = weight.shape[0]
    k = kernel_size
    if k % 2 == 0:
        # PyTorch pads asymmetrically for even kernel sizes with padding='same'.
        raise NotImplementedError("even kernel_size with 'same' padding is not supported")
    pad = k // 2
    kdim = k * k * cin
    m = h * w
    itemsize = jnp.dtype(x_nchw.dtype).itemsize
    w_itemsize = jnp.dtype(weight.dtype).itemsize

    # ---- build X as (N, K, M) so M (= H*W) lands on the lane axis ----
    if k == 1:
        # NCHW is already (N, Cin, H*W)-contiguous: free reshape, no HBM passes.
        x_mat = x_nchw.reshape(n, cin, m)
        w_mat = weight.reshape(cout, cin)
    else:
        # TODO(synk): replace this k^2x im2col HBM expansion with in-kernel
        # (kh, kw) tap accumulation over an 'arbitrary' grid axis (and add K
        # tiling + f32 accumulator for very large Cin*k^2).
        x_pad = jnp.pad(x_nchw, ((0, 0), (0, 0), (pad, pad), (pad, pad)))
        patches = jnp.concatenate(
            [x_pad[:, :, kh:kh + h, kw:kw + w] for kh in range(k) for kw in range(k)],
            axis=1)                                           # (N, k*k*Cin, H, W)
        x_mat = patches.reshape(n, kdim, m)
        w_mat = jnp.transpose(weight, (0, 2, 3, 1)).reshape(cout, kdim)
    b_col = bias.reshape(cout, 1)

    # ---- generation-aware sizing ----
    vmem_cap, two_cores = _tpu_vmem_info()
    budget = int(vmem_cap * 0.40)          # tile-data budget (double-buffered tiles)
    vmem_limit = int(vmem_cap * 0.75)

    sub = 8 * max(1, 4 // itemsize)        # sublane packing: f32->8, bf16->16, int8->32
    tcout = cout if cout <= 512 else 256   # Cout tiling bounds VMEM for big heads
    grid_co = pl.cdiv(cout, tcout)

    kdim_s = _round_up(kdim, sub)          # x-tile sublane padding
    kdim_l = _round_up(kdim, 128)          # weight-tile lane padding
    cout_s = _round_up(tcout, sub)         # weight/out/bias sublane padding

    # Grid-constant weight/bias: single-buffer them when big enough to matter
    # (halves their VMEM footprint; no extra DMA since their block never changes
    # along the batch / M grid axes).
    w_tile_bytes = cout_s * kdim_l * w_itemsize
    single_buffer_w = w_tile_bytes >= (1 << 20)
    w_bufs = 1 if single_buffer_w else 2
    fixed = w_bufs * (cout_s * kdim_l + cout_s * 128) * w_itemsize

    # Columns (lanes of work) per grid step:
    #   * at least `tm` lanes,
    #   * enough lanes that each step moves ~step_bytes of real HBM traffic,
    #   * never more than the (layout-padded, double-buffered) VMEM budget.
    per_col_pad = 2 * (kdim_s + cout_s) * itemsize   # x + out tile bytes per column
    per_col_raw = (kdim + tcout) * itemsize          # real HBM bytes per column
    cols_cap = max(128, ((budget - fixed) // per_col_pad) // 128 * 128)
    cols_want = max(_round_up(tm, 128), _round_up(step_bytes // per_col_raw, 128))
    cols = min(cols_cap, cols_want)

    m128 = _round_up(m, 128)
    if m128 > cols:
        # Big images: tile M (multiple of 128; ragged tail handled by Pallas'
        # partial-edge-block masking — no HBM pad/slice copies).
        bb = 1
        tm_eff = cols
    else:
        # Small images: one full-M block per image, batch several images per step
        # to amortize per-step overhead (cap keeps the unrolled loop small).
        bb = min(n, 16, max(1, cols // m128))
        tm_eff = m                     # full-dim block (valid even if m % 128 != 0)
    grid_b = pl.cdiv(n, bb)
    grid_m = pl.cdiv(m, tm_eff)

    # 2-TensorCore chips (v7x): ensure >= 2 parallel grid steps; on 1-TC chips
    # (v5e/v6e) splitting a single tile only adds overhead, so skip it.
    if two_cores and grid_b * grid_co * grid_m < 2:
        if n >= 2:
            bb = -(-n // 2)
            grid_b = pl.cdiv(n, bb)
        elif m128 >= 256:
            tm_eff = max(128, (m128 // 2) // 128 * 128)
            grid_m = pl.cdiv(m, tm_eff)

    grid = (grid_b, grid_co, grid_m)

    x_spec = pl.BlockSpec((bb, kdim, tm_eff), lambda b, co, i: (b, 0, i))
    o_spec = pl.BlockSpec((bb, tcout, tm_eff), lambda b, co, i: (b, co, i))
    if single_buffer_w:
        w_spec = pl.BlockSpec((tcout, kdim), lambda b, co, i: (co, 0),
                              pipeline_mode=pl.Buffered(1))
        b_spec = pl.BlockSpec((tcout, 1), lambda b, co, i: (co, 0),
                              pipeline_mode=pl.Buffered(1))
    else:
        w_spec = pl.BlockSpec((tcout, kdim), lambda b, co, i: (co, 0))
        b_spec = pl.BlockSpec((tcout, 1), lambda b, co, i: (co, 0))

    out_mat = pl.pallas_call(
        _outconv_kernel,
        out_shape=jax.ShapeDtypeStruct((n, cout, m), x_nchw.dtype),
        grid_spec=pltpu.PrefetchScalarGridSpec(
            num_scalar_prefetch=0,
            grid=grid,
            in_specs=[x_spec, w_spec, b_spec],
            out_specs=o_spec,
        ),
        compiler_params=pltpu.CompilerParams(
            dimension_semantics=("parallel", "parallel", "parallel"),
            vmem_limit_bytes=vmem_limit,
        ),
        cost_estimate=pl.CostEstimate(
            flops=2 * n * kdim * cout * m,
            transcendentals=0,
            bytes_accessed=(n * kdim * m + cout * kdim + cout + n * cout * m) * itemsize,
        ),
    )(x_mat, w_mat, b_col)

    # No M padding was added, so this reshape back to NCHW is free.
    return out_mat.reshape(n, cout, h, w)


def init_params(key, in_channels, out_channels, kernel_size=1):
    """Deterministic Conv2d-style init (uniform in +/- 1/sqrt(fan_in))."""
    fan_in = in_channels * kernel_size * kernel_size
    bound = 1.0 / (fan_in ** 0.5)
    kw, kb = jax.random.split(key)
    weight = jax.random.uniform(
        kw, (out_channels, in_channels, kernel_size, kernel_size),
        minval=-bound, maxval=bound, dtype=jnp.float32)
    bias = jax.random.uniform(
        kb, (out_channels,), minval=-bound, maxval=bound, dtype=jnp.float32)
    return weight, bias


if __name__ == "__main__":
    key = jax.random.PRNGKey(0)
    kx, kp = jax.random.split(key)

    N, CIN, COUT, H, W = 2, 4, 3, 16, 16
    KSIZE = 1  # module default

    x = jax.random.normal(kx, (N, CIN, H, W), dtype=jnp.float32)
    weight, bias = init_params(kp, CIN, COUT, KSIZE)

    out = out_conv_block(x, weight, bias, kernel_size=KSIZE)
    out = jax.block_until_ready(out)

    # reference check (pure JAX 1x1 conv)
    ref = jnp.einsum("nchw,oc->nohw", x, weight[:, :, 0, 0]) + bias[None, :, None, None]
    assert out.shape == (N, COUT, H, W)
    assert jnp.allclose(out, ref, atol=1e-5, rtol=1e-5)

    print("KERNEL_OK")
</pallas_src>

<mosaic_0001>
module attributes {stable_mosaic.version = 11 : i64} {
  func.func @_outconv_kernel(%arg0: i32, %arg1: i32, %arg2: i32, %arg3: memref<1x4x256xf32, #tpu.memory_space<vmem>>, %arg4: memref<3x4xf32, #tpu.memory_space<vmem>>, %arg5: memref<3x1xf32, #tpu.memory_space<vmem>>, %arg6: memref<1x3x256xf32, #tpu.memory_space<vmem>>) attributes {dimension_semantics = [#tpu.dimension_semantics<parallel>, #tpu.dimension_semantics<parallel>, #tpu.dimension_semantics<parallel>], iteration_bounds = array<i64: 2, 1, 1>, scalar_prefetch = 0 : i64, scratch_operands = 0 : i64, tpu.core_type = #tpu.core_type<tc>, window_params = [{transform_indices = @transform_0, window_bounds = array<i64: 1, 4, 256>}, {transform_indices = @transform_1, window_bounds = array<i64: 3, 4>}, {transform_indices = @transform_2, window_bounds = array<i64: 3, 1>}, {transform_indices = @transform_3, window_bounds = array<i64: 1, 3, 256>}]} {
    %c0 = arith.constant 0 : index
    %c0_0 = arith.constant 0 : index
    %0 = vector.load %arg4[%c0, %c0_0] : memref<3x4xf32, #tpu.memory_space<vmem>>, vector<3x4xf32>
    %c0_1 = arith.constant 0 : index
    %c0_2 = arith.constant 0 : index
    %1 = vector.load %arg5[%c0_1, %c0_2] : memref<3x1xf32, #tpu.memory_space<vmem>>, vector<3x1xf32>
    %c0_3 = arith.constant 0 : index
    %c0_4 = arith.constant 0 : index
    %c0_5 = arith.constant 0 : index
    %2 = vector.load %arg3[%c0_3, %c0_4, %c0_5] : memref<1x4x256xf32, #tpu.memory_space<vmem>>, vector<1x4x256xf32>
    %3 = vector.shape_cast %2 : vector<1x4x256xf32> to vector<4x256xf32>
    %cst = arith.constant dense<0.000000e+00> : vector<3x256xf32>
    %4 = tpu.matmul %0, %3, %cst {dimension_numbers = #tpu.dot_dimension_numbers<[1], [0], [0], [1], [0, 0, 1, 1], [], []>} : vector<3x4xf32>, vector<4x256xf32>, vector<3x256xf32> -> vector<3x256xf32>
    %5 = vector.broadcast %1 : vector<3x1xf32> to vector<3x256xf32>
    %6 = arith.addf %4, %5 : vector<3x256xf32>
    %c0_6 = arith.constant 0 : index
    %c0_7 = arith.constant 0 : index
    %c0_8 = arith.constant 0 : index
    %7 = vector.load %arg6[%c0_6, %c0_7, %c0_8] : memref<1x3x256xf32, #tpu.memory_space<vmem>>, vector<1x3x256xf32>
    %8 = vector.shape_cast %7 : vector<1x3x256xf32> to vector<3x256xf32>
    %9 = vector.shape_cast %6 : vector<3x256xf32> to vector<1x3x256xf32>
    tpu.vector_store %arg6[%c0_6, %c0_7, %c0_8], %9 {strides = array<i32>} : memref<1x3x256xf32, #tpu.memory_space<vmem>>, vector<1x3x256xf32>,
    return
  }
  func.func @transform_0(%arg0: i32, %arg1: i32, %arg2: i32) -> (i32, i32, i32) {
    %c0_i32 = arith.constant 0 : i32
    %c0_i32_0 = arith.constant 0 : i32
    return %arg0, %c0_i32, %arg2 : i32, i32, i32
  }
  func.func @transform_1(%arg0: i32, %arg1: i32, %arg2: i32) -> (i32, i32) {
    %c0_i32 = arith.constant 0 : i32
    %c0_i32_0 = arith.constant 0 : i32
    return %arg1, %c0_i32 : i32, i32
  }
  func.func @transform_2(%arg0: i32, %arg1: i32, %arg2: i32) -> (i32, i32) {
    %c0_i32 = arith.constant 0 : i32
    %c0_i32_0 = arith.constant 0 : i32
    return %arg1, %c0_i32 : i32, i32
  }
  func.func @transform_3(%arg0: i32, %arg1: i32, %arg2: i32) -> (i32, i32, i32) {
    %c0_i32 = arith.constant 0 : i32
    return %arg0, %arg1, %arg2 : i32, i32, i32
  }
}

</mosaic_0001>

<bundles_post_ra>
// kernel: out_conv_block.1
= control target key start
LH: loop header
LB: loop body
LE: loop exit
PB: predicated region body
PF: predicated region fallthrough
CT: control target
= control target key end

     0   :  { %s584_s12 = smov 0   ;;  %s586_s13 = smov 0   ;;  %s623_s0 = inlined_call_operand.vmem [shape: f32[2,4,256], index: 0, kind: input, shape index: {}]   ;;  %s624_s1 = inlined_call_operand.vmem [shape: f32[3,4], index: 1, kind: input, shape index: {}]   ;;  %s625_s2 = inlined_call_operand.vmem [shape: f32[3,1], index: 2, kind: input, shape index: {}]   ;;  %s626_s3 = inlined_call_operand.vmem [shape: f32[2,3,256], index: 3, kind: output, shape index: {}]  }
   0x1   :  { %s588_s14 = smov 0  }
   0x2 LB: > { %s32_s15 = sadd.s32 1, %s556_s13  ;;  %p498_p0 = scmp.ge.s32.totalorder %s560_s14, 1  ;;  %s560_s14 = sphi %s588_s14, %s13_s14   ;;  %s556_s13 = sphi %s586_s13, %s628_s13   ;;  %s552_s12 = sphi %s584_s12, %s627_s12  }
   0x3   : > { %p34_p1 = scmp.ge.s32.totalorder %s32_s15, 2  ;;  %p185_p2 = scmp.lt.s32.totalorder %s560_s14, 3 }
   0x5   : > { %s630_s15 = smov (%p34_p1, %s32_s15), 0  ;;  %p186_p3 = pnand %p498_p0, %p185_p2 }
   0x6   : > { %p230_p4 = scmp.lt.s32.totalorder (!%p186_p3), %s552_s12, 1 }
   0x7   : > { %189 = sbr.rel (%p186_p3) target bundleno = 220 (0xdc), region = 32 }
   0xc   : > { %v562_v0 = vmov 0.0   ;;  %v262_v1 = vld [vmem:[%s625_s2] sm:$0x7]  ;;  %s632_s12 = smov (!%p230_p4, %s552_s12), 1  ;;  %v563_v2 = vmov 0   ;;  %vm275_vm0 = vcmask 1043456  }
   0xd   : > { %344 = vmatprep.mubr.f32.mxu0 %v562_v0  ;;  %536 = vset.pattern.permute.xlu0 %v563_v2  ;;  %s508_s18 = sshll.u32 %s632_s12, 3  ;;  %v261_v5 = vld [vmem:[%s624_s1] sm:$0x7]  ;;  %vm271_vm1 = vcmask 31744  }
   0xe   : > { %266 = vperm.xlu0 %536, %v262_v1   ;;  %s237_s21 = scalar_lea.vmem %s623_s0, %s508_s18  ;;  %s259_s26 = scalar_lea.vmem %s626_s3, %s508_s18 }
   0xf   : > { %v263_v3 = vld [vmem:[%s237_s21] sm:$0xff] }
  0x10   : > { %v270_v4 = vcombine.high %v263_v3, %v263_v3 }
  0x12   : > { %503 = vmatprep.subr.msk.mxu0 %vm275_vm0, %v270_v4 }
  0x13   : > { %504 = vmatpush1.msk.msra.mxu0 %vm275_vm0, %v263_v3 }
  0x14   : > { %505 = vmatmul.mubr.msk.f32.vlgmr.msra.gmra.mxu0 %vm271_vm1, %v261_v5 }
  0x89   : > { %v267_v6 = vpop.permute.xlu0 %266 }
  0xd4   : > { %v346_v7 = vpop.f32.mrf.mxu0 }
  0xd5   : > { %v347_v9 = vadd.f32 %v346_v7, %v267_v6 }
  0xd6   : > { %v348_v8 = vpop.f32.mrf.mxu0 }
  0xd7   : > { %v349_v10 = vadd.f32 %v348_v8, %v267_v6 }
  0xd9   : > { %v353_v11 = vcombine.low %v347_v9, %v349_v10 }
  0xdb   : > { %355 = vst [vmem:[%s259_s26] sm:$0x77] %v353_v11 }
  0xdc PF: > { %s13_s14 = sadd.s32 1, %s560_s14   ;;  %s627_s12 = smov %s556_s13 }
  0xdd   : > { %p10_p5 = scmp.ge.s32.totalorder %s13_s14, 4   ;;  %s628_s13 = smov %s630_s15 }
  0xdf   :  { %12 = sbr.rel (!%p10_p5) target bundleno = 2 (0x2), region = 68 }

</bundles_post_ra>
